<compile_context>
chip_gen: v7x
topology: tpu7x:2x2x1
jax: 0.10.0
libtpu: 0.0.40
codegen_flags: <defaults>
</compile_context>

<pallas_src>
import functools
import math

import jax
import jax.numpy as jnp
from jax import lax
from jax.experimental import pallas as pl
from jax.experimental.pallas import tpu as pltpu

_LOG2E = 1.4426950408889634


def _flash_sdpa_kernel(q_ref, k_ref, v_ref, o_ref, m_sc, l_sc, acc_sc, *,
                       scale_log2e, kv_valid, kv_block, needs_kv_mask):
    # q_ref: (1, TQ, Dp)   k_ref/v_ref: (1, TK, Dp)   o_ref: (1, TQ, Dp)
    kv_idx = pl.program_id(2)

    # Scale the small (TQ, Dp) Q tile (not the (TQ, TK) scores); log2(e) is
    # folded in so the softmax uses exp2 with no extra range-reduction mul.
    q = q_ref[0] * scale_log2e
    k = k_ref[0]
    v = v_ref[0]

    # S = Q @ K^T, contracting last dims of both operands (no transpose / XLU).
    s = lax.dot_general(q, k, (((1,), (1,)), ((), ())),
                        preferred_element_type=jnp.float32)   # (TQ, TK), log2 domain

    if needs_kv_mask:
        # Only the final KV block contains padded columns; the where on earlier
        # blocks is cheap VPU filler under the EUP-bound exp.
        col = kv_idx * kv_block + lax.broadcasted_iota(jnp.int32, s.shape, 1)
        s = jnp.where(col < kv_valid, s, -jnp.inf)

    m_blk = jnp.max(s, axis=-1, keepdims=True)

    @pl.when(kv_idx == 0)
    def _first_block():
        # Fast path: direct assignment, no -inf init / alpha rescale on step 0.
        p = jnp.exp2(s - m_blk)
        m_sc[...] = m_blk
        l_sc[...] = jnp.sum(p, axis=-1, keepdims=True)
        acc_sc[...] = jnp.dot(p.astype(v.dtype), v,
                              preferred_element_type=jnp.float32)

    @pl.when(kv_idx > 0)
    def _update():
        m_prev = m_sc[...]
        m_new = jnp.maximum(m_prev, m_blk)
        alpha = jnp.exp2(m_prev - m_new)
        p = jnp.exp2(s - m_new)
        l_sc[...] = alpha * l_sc[...] + jnp.sum(p, axis=-1, keepdims=True)
        acc_sc[...] = alpha * acc_sc[...] + jnp.dot(
            p.astype(v.dtype), v, preferred_element_type=jnp.float32)
        m_sc[...] = m_new

    # TODO(synk): dropout_p is an undefined global in the reference module, so
    # dropout is the identity here. For p > 0, draw a mask with
    # pltpu.prng_random_bits on `p` above and scale by 1/(1-p).

    @pl.when(kv_idx == pl.num_programs(2) - 1)
    def _finalize():
        # Exact divide: runs once per Q tile, negligible cost, tight f32 output.
        o_ref[0] = (acc_sc[...] / l_sc[...]).astype(o_ref.dtype)


def _round_up(x, m):
    return ((x + m - 1) // m) * m


def _pick_tile(n, target, min_align):
    """Tile size (multiple of the alignment) <= target; the array axis gets
    zero-padded up to a multiple of the returned tile, so VMEM is bounded by
    the target regardless of the sequence length (no full-extent fallback)."""
    align = 128 if n >= 128 else min_align        # MXU / lane friendly when possible
    target = max((target // align) * align, align)
    n_al = _round_up(n, align)
    if n_al <= target:
        return n_al
    t = target
    while t >= align:                             # largest aligned divisor of padded n
        if n_al % t == 0:
            return t
        t -= align
    return target                                 # accept (< tile) tail padding + mask


def _vmem_limit_bytes(tq, tk, dp, itemsize):
    # Double-buffered I/O blocks + f32 scratch, with 2x headroom for compiler
    # internal scratch; capped safely below v7x's 64 MiB physical VMEM.
    io = 2 * itemsize * (tq * dp          # Q
                         + 2 * tk * dp    # K + V
                         + tq * dp)       # O
    scratch = 4 * (tq * dp + 2 * tq * 128)
    return int(min(max(2 * (io + scratch), 32 << 20), 56 << 20))


def sdpa(query, key, value, *, dimension_per_head=None,
         q_rows_tile=512, kv_tile=1024, pad_head_dim=True):
    """query: (B, Hq, Sq, D); key/value: (B, Hk, Sk, D) with Hq % Hk == 0 (GQA)."""
    B, Hq, Sq, D = query.shape
    Bk, Hk, Sk, Dk = key.shape
    assert Bk == B and Dk == D and value.shape == key.shape
    assert Hq % Hk == 0, "query heads must be a multiple of kv heads (broadcast / GQA)"
    if dimension_per_head is None:
        dimension_per_head = D
    scale_log2e = (1.0 / math.sqrt(dimension_per_head)) * _LOG2E

    # Pack the R query heads that share a KV head into the row axis with pure
    # reshapes: no HBM materialization of a broadcast K/V.
    R = Hq // Hk
    BH = B * Hk
    rows = R * Sq
    q = query.reshape(BH, rows, D)
    k = key.reshape(BH, Sk, D)
    v = value.reshape(BH, Sk, D)

    in_dt = query.dtype
    itemsize = jnp.dtype(in_dt).itemsize
    min_align = 16 if itemsize == 2 else 8

    # Lane-dense head dim: pad D to a multiple of 128 so the PV matmul and the
    # output stores use full vregs / unmasked vst (biggest store-side lever).
    Dp = _round_up(D, 128) if pad_head_dim else D

    TQ = _pick_tile(rows, q_rows_tile, min_align)
    TK = _pick_tile(Sk, kv_tile, min_align)
    rows_p = _round_up(rows, TQ)
    sk_p = _round_up(Sk, TK)

    def _pad(x, r_to, c_to):
        pr, pc = r_to - x.shape[1], c_to - x.shape[2]
        if pr or pc:
            x = jnp.pad(x, ((0, 0), (0, pr), (0, pc)))
        return x

    q = _pad(q, rows_p, Dp)   # padded Q rows give finite junk; sliced off below
    k = _pad(k, sk_p, Dp)     # padded KV rows are masked to -inf in-kernel
    v = _pad(v, sk_p, Dp)

    grid = (BH, rows_p // TQ, sk_p // TK)   # KV (reduction) axis last

    kernel = functools.partial(
        _flash_sdpa_kernel,
        scale_log2e=scale_log2e,
        kv_valid=Sk,
        kv_block=TK,
        needs_kv_mask=(sk_p != Sk),
    )

    out = pl.pallas_call(
        kernel,
        out_shape=jax.ShapeDtypeStruct((BH, rows_p, Dp), in_dt),
        grid_spec=pltpu.PrefetchScalarGridSpec(
            num_scalar_prefetch=0,
            grid=grid,
            in_specs=[
                pl.BlockSpec((1, TQ, Dp), lambda bh, qi, ki: (bh, qi, 0)),
                # TODO(synk): add pipeline_mode=pl.Buffered(3) on K/V only if a
                # trace shows exposed DMA at the chosen TK.
                pl.BlockSpec((1, TK, Dp), lambda bh, qi, ki: (bh, ki, 0)),
                pl.BlockSpec((1, TK, Dp), lambda bh, qi, ki: (bh, ki, 0)),
            ],
            out_specs=pl.BlockSpec((1, TQ, Dp), lambda bh, qi, ki: (bh, qi, 0)),
            scratch_shapes=[
                pltpu.VMEM((TQ, 1), jnp.float32),    # running max m (log2 domain)
                pltpu.VMEM((TQ, 1), jnp.float32),    # running denom l
                pltpu.VMEM((TQ, Dp), jnp.float32),   # unnormalized output acc
            ],
        ),
        compiler_params=pltpu.CompilerParams(
            dimension_semantics=("parallel", "parallel", "arbitrary"),
            vmem_limit_bytes=_vmem_limit_bytes(TQ, TK, Dp, itemsize),
        ),
    )(q, k, v)

    out = out[:, :rows, :D]
    return out.reshape(B, Hq, Sq, D)


def sdpa_reference(query, key, value, *, dimension_per_head=None):
    B, Hq, Sq, D = query.shape
    _, Hk, Sk, _ = key.shape
    if dimension_per_head is None:
        dimension_per_head = D
    r = Hq // Hk
    qf = query.astype(jnp.float32)
    kf = jnp.repeat(key, r, axis=1).astype(jnp.float32)
    vf = jnp.repeat(value, r, axis=1).astype(jnp.float32)
    s = jnp.einsum("bhqd,bhkd->bhqk", qf, kf) / math.sqrt(dimension_per_head)
    p = jax.nn.softmax(s, axis=-1)
    return jnp.einsum("bhqk,bhkd->bhqd", p, vf)


if __name__ == "__main__":
    root = jax.random.PRNGKey(0)

    # Case 1: the module's shapes — 12 query heads sharing 6 KV heads (GQA);
    # exercises D padding (36 -> 128) and KV tail padding/masking (12 -> 16).
    kq, kk, kv_ = jax.random.split(jax.random.fold_in(root, 0), 3)
    q1 = jax.random.normal(kq, (1, 12, 12, 36), dtype=jnp.float32)
    k1 = jax.random.normal(kk, (1, 6, 12, 36), dtype=jnp.float32)
    v1 = jax.random.normal(kv_, (1, 6, 12, 36), dtype=jnp.float32)
    o1 = jax.block_until_ready(sdpa(q1, k1, v1, dimension_per_head=36))
    r1 = sdpa_reference(q1, k1, v1, dimension_per_head=36)
    assert o1.shape == (1, 12, 12, 36)
    assert jnp.allclose(o1, r1, atol=2e-2, rtol=2e-2), "case 1 mismatch vs reference"

    # Case 2: bf16, equal heads, longer KV with an explicit smaller kv_tile so
    # multiple KV blocks exercise the online-softmax accumulation.
    kq, kk, kv_ = jax.random.split(jax.random.fold_in(root, 1), 3)
    q2 = jax.random.normal(kq, (1, 4, 128, 64), dtype=jnp.bfloat16)
    k2 = jax.random.normal(kk, (1, 4, 1024, 64), dtype=jnp.bfloat16)
    v2 = jax.random.normal(kv_, (1, 4, 1024, 64), dtype=jnp.bfloat16)
    o2 = jax.block_until_ready(sdpa(q2, k2, v2, kv_tile=256))
    r2 = sdpa_reference(q2, k2, v2)
    assert o2.shape == (1, 4, 128, 64)
    assert jnp.allclose(o2.astype(jnp.float32), r2, atol=2e-2, rtol=2e-2), \
        "case 2 mismatch vs reference"

    # Case 3: awkward KV length (300) with multiple blocks -> last block is
    # partially masked; exercises the padded-tail path across blocks.
    kq, kk, kv_ = jax.random.split(jax.random.fold_in(root, 2), 3)
    q3 = jax.random.normal(kq, (1, 2, 64, 36), dtype=jnp.float32)
    k3 = jax.random.normal(kk, (1, 2, 300, 36), dtype=jnp.float32)
    v3 = jax.random.normal(kv_, (1, 2, 300, 36), dtype=jnp.float32)
    o3 = jax.block_until_ready(sdpa(q3, k3, v3, kv_tile=128))
    r3 = sdpa_reference(q3, k3, v3)
    assert o3.shape == (1, 2, 64, 36)
    assert jnp.allclose(o3, r3, atol=2e-2, rtol=2e-2), "case 3 mismatch vs reference"

    print("KERNEL_OK")
</pallas_src>

<mosaic_0001>
module attributes {stable_mosaic.version = 11 : i64} {
  func.func @_flash_sdpa_kernel(%arg0: i32, %arg1: i32, %arg2: i32, %arg3: memref<1x24x128xf32, #tpu.memory_space<vmem>>, %arg4: memref<1x16x128xf32, #tpu.memory_space<vmem>>, %arg5: memref<1x16x128xf32, #tpu.memory_space<vmem>>, %arg6: memref<1x24x128xf32, #tpu.memory_space<vmem>>, %arg7: memref<24x1xf32, #tpu.memory_space<vmem>>, %arg8: memref<24x1xf32, #tpu.memory_space<vmem>>, %arg9: memref<24x128xf32, #tpu.memory_space<vmem>>) attributes {dimension_semantics = [#tpu.dimension_semantics<parallel>, #tpu.dimension_semantics<parallel>, #tpu.dimension_semantics<arbitrary>], iteration_bounds = array<i64: 6, 1, 1>, scalar_prefetch = 0 : i64, scratch_operands = 3 : i64, tpu.core_type = #tpu.core_type<tc>, window_params = [{transform_indices = @transform_0, window_bounds = array<i64: 1, 24, 128>}, {transform_indices = @transform_1, window_bounds = array<i64: 1, 16, 128>}, {transform_indices = @transform_2, window_bounds = array<i64: 1, 16, 128>}, {transform_indices = @transform_3, window_bounds = array<i64: 1, 24, 128>}]} {
    %c0 = arith.constant 0 : index
    %c0_0 = arith.constant 0 : index
    %c0_1 = arith.constant 0 : index
    %0 = vector.load %arg3[%c0, %c0_0, %c0_1] : memref<1x24x128xf32, #tpu.memory_space<vmem>>, vector<1x24x128xf32>
    %1 = vector.shape_cast %0 : vector<1x24x128xf32> to vector<24x128xf32>
    %cst = arith.constant 0.240449175 : f32
    %2 = vector.broadcast %cst : f32 to vector<24x128xf32>
    %3 = arith.mulf %1, %2 : vector<24x128xf32>
    %c0_2 = arith.constant 0 : index
    %c0_3 = arith.constant 0 : index
    %c0_4 = arith.constant 0 : index
    %4 = vector.load %arg4[%c0_2, %c0_3, %c0_4] : memref<1x16x128xf32, #tpu.memory_space<vmem>>, vector<1x16x128xf32>
    %5 = vector.shape_cast %4 : vector<1x16x128xf32> to vector<16x128xf32>
    %c0_5 = arith.constant 0 : index
    %c0_6 = arith.constant 0 : index
    %c0_7 = arith.constant 0 : index
    %6 = vector.load %arg5[%c0_5, %c0_6, %c0_7] : memref<1x16x128xf32, #tpu.memory_space<vmem>>, vector<1x16x128xf32>
    %7 = vector.shape_cast %6 : vector<1x16x128xf32> to vector<16x128xf32>
    %cst_8 = arith.constant dense<0.000000e+00> : vector<24x16xf32>
    %8 = tpu.matmul %3, %5, %cst_8 {dimension_numbers = #tpu.dot_dimension_numbers<[1], [1], [0], [0], [0, 0, 1, 0], [], []>} : vector<24x128xf32>, vector<16x128xf32>, vector<24x16xf32> -> vector<24x16xf32>
    %c16_i32 = arith.constant 16 : i32
    %9 = arith.muli %arg2, %c16_i32 : i32
    %10 = tpu.iota {dimensions = array<i32: 1>} : vector<24x16xi32>
    %11 = vector.broadcast %9 : i32 to vector<24x16xi32>
    %12 = arith.addi %11, %10 : vector<24x16xi32>
    %c12_i32 = arith.constant 12 : i32
    %13 = vector.broadcast %c12_i32 : i32 to vector<24x16xi32>
    %14 = arith.cmpi slt, %12, %13 : vector<24x16xi32>
    %cst_9 = arith.constant 0xFF800000 : f32
    %15 = vector.broadcast %cst_9 : f32 to vector<24x16xf32>
    %16 = arith.select %14, %8, %15 : vector<24x16xi1>, vector<24x16xf32>
    %cst_10 = arith.constant dense<0xFF800000> : vector<24xf32>
    %17 = vector.multi_reduction <maximumf>, %16, %cst_10 [1] : vector<24x16xf32> to vector<24xf32>
    %18 = vector.shape_cast %17 : vector<24xf32> to vector<24x1xf32>
    %c0_i32 = arith.constant 0 : i32
    %19 = arith.cmpi eq, %arg2, %c0_i32 : i32
    %20 = arith.extui %19 : i1 to i32
    %c0_i32_11 = arith.constant 0 : i32
    %21 = arith.cmpi ne, %20, %c0_i32_11 : i32
    scf.if %21 {
      %28 = vector.broadcast %18 : vector<24x1xf32> to vector<24x16xf32>
      %29 = arith.subf %16, %28 : vector<24x16xf32>
      %30 = math.exp2 %29 : vector<24x16xf32>
      %c0_16 = arith.constant 0 : index
      %c0_17 = arith.constant 0 : index
      %31 = vector.load %arg7[%c0_16, %c0_17] : memref<24x1xf32, #tpu.memory_space<vmem>>, vector<24x1xf32>
      tpu.vector_store %arg7[%c0_16, %c0_17], %18 {strides = array<i32>} : memref<24x1xf32, #tpu.memory_space<vmem>>, vector<24x1xf32>,
      %cst_18 = arith.constant dense<0.000000e+00> : vector<24xf32>
      %32 = vector.multi_reduction <add>, %30, %cst_18 [1] : vector<24x16xf32> to vector<24xf32>
      %33 = vector.shape_cast %32 : vector<24xf32> to vector<24x1xf32>
      %c0_19 = arith.constant 0 : index
      %c0_20 = arith.constant 0 : index
      %34 = vector.load %arg8[%c0_19, %c0_20] : memref<24x1xf32, #tpu.memory_space<vmem>>, vector<24x1xf32>
      tpu.vector_store %arg8[%c0_19, %c0_20], %33 {strides = array<i32>} : memref<24x1xf32, #tpu.memory_space<vmem>>, vector<24x1xf32>,
      %cst_21 = arith.constant dense<0.000000e+00> : vector<24x128xf32>
      %35 = tpu.matmul %30, %7, %cst_21 {dimension_numbers = #tpu.dot_dimension_numbers<[1], [0], [0], [1], [0, 0, 1, 1], [], []>} : vector<24x16xf32>, vector<16x128xf32>, vector<24x128xf32> -> vector<24x128xf32>
      %c0_22 = arith.constant 0 : index
      %c0_23 = arith.constant 0 : index
      %36 = vector.load %arg9[%c0_22, %c0_23] : memref<24x128xf32, #tpu.memory_space<vmem>>, vector<24x128xf32>
      tpu.vector_store %arg9[%c0_22, %c0_23], %35 {strides = array<i32>} : memref<24x128xf32, #tpu.memory_space<vmem>>, vector<24x128xf32>,
    } else {
    }
    %c0_i32_12 = arith.constant 0 : i32
    %22 = arith.cmpi sgt, %arg2, %c0_i32_12 : i32
    %23 = arith.extui %22 : i1 to i32
    %c0_i32_13 = arith.constant 0 : i32
    %24 = arith.cmpi ne, %23, %c0_i32_13 : i32
    scf.if %24 {
      %c0_16 = arith.constant 0 : index
      %c0_17 = arith.constant 0 : index
      %28 = vector.load %arg7[%c0_16, %c0_17] : memref<24x1xf32, #tpu.memory_space<vmem>>, vector<24x1xf32>
      %29 = arith.maximumf %28, %18 : vector<24x1xf32>
      %30 = arith.subf %28, %29 : vector<24x1xf32>
      %31 = math.exp2 %30 : vector<24x1xf32>
      %32 = vector.broadcast %29 : vector<24x1xf32> to vector<24x16xf32>
      %33 = arith.subf %16, %32 : vector<24x16xf32>
      %34 = math.exp2 %33 : vector<24x16xf32>
      %c0_18 = arith.constant 0 : index
      %c0_19 = arith.constant 0 : index
      %35 = vector.load %arg8[%c0_18, %c0_19] : memref<24x1xf32, #tpu.memory_space<vmem>>, vector<24x1xf32>
      %36 = arith.mulf %31, %35 : vector<24x1xf32>
      %cst_20 = arith.constant dense<0.000000e+00> : vector<24xf32>
      %37 = vector.multi_reduction <add>, %34, %cst_20 [1] : vector<24x16xf32> to vector<24xf32>
      %38 = vector.shape_cast %37 : vector<24xf32> to vector<24x1xf32>
      %39 = arith.addf %36, %38 : vector<24x1xf32>
      %c0_21 = arith.constant 0 : index
      %c0_22 = arith.constant 0 : index
      %40 = vector.load %arg8[%c0_21, %c0_22] : memref<24x1xf32, #tpu.memory_space<vmem>>, vector<24x1xf32>
      tpu.vector_store %arg8[%c0_21, %c0_22], %39 {strides = array<i32>} : memref<24x1xf32, #tpu.memory_space<vmem>>, vector<24x1xf32>,
      %c0_23 = arith.constant 0 : index
      %c0_24 = arith.constant 0 : index
      %41 = vector.load %arg9[%c0_23, %c0_24] : memref<24x128xf32, #tpu.memory_space<vmem>>, vector<24x128xf32>
      %42 = vector.broadcast %31 : vector<24x1xf32> to vector<24x128xf32>
      %43 = arith.mulf %42, %41 : vector<24x128xf32>
      %cst_25 = arith.constant dense<0.000000e+00> : vector<24x128xf32>
      %44 = tpu.matmul %34, %7, %cst_25 {dimension_numbers = #tpu.dot_dimension_numbers<[1], [0], [0], [1], [0, 0, 1, 1], [], []>} : vector<24x16xf32>, vector<16x128xf32>, vector<24x128xf32> -> vector<24x128xf32>
      %45 = arith.addf %43, %44 : vector<24x128xf32>
      %c0_26 = arith.constant 0 : index
      %c0_27 = arith.constant 0 : index
      %46 = vector.load %arg9[%c0_26, %c0_27] : memref<24x128xf32, #tpu.memory_space<vmem>>, vector<24x128xf32>
      tpu.vector_store %arg9[%c0_26, %c0_27], %45 {strides = array<i32>} : memref<24x128xf32, #tpu.memory_space<vmem>>, vector<24x128xf32>,
      %c0_28 = arith.constant 0 : index
      %c0_29 = arith.constant 0 : index
      %47 = vector.load %arg7[%c0_28, %c0_29] : memref<24x1xf32, #tpu.memory_space<vmem>>, vector<24x1xf32>
      tpu.vector_store %arg7[%c0_28, %c0_29], %29 {strides = array<i32>} : memref<24x1xf32, #tpu.memory_space<vmem>>, vector<24x1xf32>,
    } else {
    }
    %c0_i32_14 = arith.constant 0 : i32
    %25 = arith.cmpi eq, %arg2, %c0_i32_14 : i32
    %26 = arith.extui %25 : i1 to i32
    %c0_i32_15 = arith.constant 0 : i32
    %27 = arith.cmpi ne, %26, %c0_i32_15 : i32
    scf.if %27 {
      %c0_16 = arith.constant 0 : index
      %c0_17 = arith.constant 0 : index
      %28 = vector.load %arg9[%c0_16, %c0_17] : memref<24x128xf32, #tpu.memory_space<vmem>>, vector<24x128xf32>
      %c0_18 = arith.constant 0 : index
      %c0_19 = arith.constant 0 : index
      %29 = vector.load %arg8[%c0_18, %c0_19] : memref<24x1xf32, #tpu.memory_space<vmem>>, vector<24x1xf32>
      %30 = vector.broadcast %29 : vector<24x1xf32> to vector<24x128xf32>
      %31 = arith.divf %28, %30 : vector<24x128xf32>
      %c0_20 = arith.constant 0 : index
      %c0_21 = arith.constant 0 : index
      %c0_22 = arith.constant 0 : index
      %32 = vector.load %arg6[%c0_20, %c0_21, %c0_22] : memref<1x24x128xf32, #tpu.memory_space<vmem>>, vector<1x24x128xf32>
      %33 = vector.shape_cast %32 : vector<1x24x128xf32> to vector<24x128xf32>
      %34 = vector.shape_cast %31 : vector<24x128xf32> to vector<1x24x128xf32>
      tpu.vector_store %arg6[%c0_20, %c0_21, %c0_22], %34 {strides = array<i32>} : memref<1x24x128xf32, #tpu.memory_space<vmem>>, vector<1x24x128xf32>,
    } else {
    }
    return
  }
  func.func @transform_0(%arg0: i32, %arg1: i32, %arg2: i32) -> (i32, i32, i32) {
    %c0_i32 = arith.constant 0 : i32
    %c0_i32_0 = arith.constant 0 : i32
    return %arg0, %arg1, %c0_i32 : i32, i32, i32
  }
  func.func @transform_1(%arg0: i32, %arg1: i32, %arg2: i32) -> (i32, i32, i32) {
    %c0_i32 = arith.constant 0 : i32
    %c0_i32_0 = arith.constant 0 : i32
    return %arg0, %arg2, %c0_i32 : i32, i32, i32
  }
  func.func @transform_2(%arg0: i32, %arg1: i32, %arg2: i32) -> (i32, i32, i32) {
    %c0_i32 = arith.constant 0 : i32
    %c0_i32_0 = arith.constant 0 : i32
    return %arg0, %arg2, %c0_i32 : i32, i32, i32
  }
  func.func @transform_3(%arg0: i32, %arg1: i32, %arg2: i32) -> (i32, i32, i32) {
    %c0_i32 = arith.constant 0 : i32
    %c0_i32_0 = arith.constant 0 : i32
    return %arg0, %arg1, %c0_i32 : i32, i32, i32
  }
}

</mosaic_0001>

<bundles_post_ra>
// kernel: tpu_custom_call.1
= control target key start
LH: loop header
LB: loop body
LE: loop exit
PB: predicated region body
PF: predicated region fallthrough
CT: control target
= control target key end

     0   :  { %s1563_s0 = inlined_call_operand.hbm [shape: f32[6,24,128], index: 0, kind: input, shape index: {}]   ;;  %s1564_s1 = inlined_call_operand.hbm [shape: f32[6,16,128], index: 1, kind: input, shape index: {}]   ;;  %s1565_s2 = inlined_call_operand.hbm [shape: f32[6,16,128], index: 2, kind: input, shape index: {}]   ;;  %s1566_s3 = inlined_call_operand.hbm [shape: f32[6,24,128], index: 3, kind: output, shape index: {}]  }
   0x1   :  { %1575 = sst [smem:[#allocation17_spill]] %s1564_s1 }
   0x2   :  { %8 = vsyncpa [#allocation6], 0 }
   0x3   :  { %10 = vsyncpa [#allocation6 + $0x1], 0 }
   0x4   :  { %11 = vsyncpa [#allocation9], 0 }
   0x5   :  { %13 = vsyncpa [#allocation9 + $0x1], 0 }
   0x6   :  { %14 = vsyncpa [#allocation7], 0 }
   0x7   :  { %16 = vsyncpa [#allocation7 + $0x1], 0  ;;  %s1271_s12 = smov 0   ;;  %s1273_s13 = smov 0  }
   0x8   :  { %s1275_s14 = smov 0   ;;  %s1277_s15 = smov 0  }
   0x9   :  { %s1279_s16 = smov 0   ;;  %s1281_s17 = smov 0  }
   0xa LB: > { %1576 = sst [smem:[#allocation15_spill]] %s1233_s16  ;;  %s1302_s18 = sadd.s32 4294967295, %s1237_s17   ;;  %s1237_s17 = sphi %s1281_s17, %s22_s17   ;;  %s1233_s16 = sphi %s1279_s16, %s1592_s16   ;;  %s1229_s15 = sphi %s1277_s15, %s1591_s15   ;;  %s1225_s14 = sphi %s1275_s14, %s1595_s14   ;;  %s1221_s13 = sphi %s1273_s13, %s1594_s13   ;;  %s1217_s12 = sphi %s1271_s12, %s1593_s12  }
   0xb   : > { %s897_s19 = sadd.s32 4294967294, %s1237_s17   ;;  %s41_s20 = sadd.s32 1, %s1233_s16 }
   0xc   : > { %s50_s21 = sadd.s32 1, %s1225_s14  ;;  %p43_p0 = scmp.ge.s32.totalorder %s41_s20, 6 }
   0xd   : > { %p57_p1 = scmp.ne.s32.totalorder %s1225_s14, %s1221_s13  ;;  %p58_p2 = scmp.eq.s32.totalorder %s1237_s17, 0 }
   0xe   : > { %p63_p3 = scmp.ne.s32.totalorder %s1221_s13, %s1217_s12  ;;  %s1597_s20 = smov (%p43_p0, %s41_s20), 0 }
   0xf   : > { %1577 = sst [smem:[#allocation16_spill]] %s1597_s20  ;;  %p59_p4 = por %p58_p2, %p57_p1 }
  0x10   : > { %p64_p5 = scmp.eq.s32.totalorder %s1302_s18, 0  ;;  %s45_s22 = ssub.s32 %s1233_s16, %s1597_s20 }
  0x11   : > { %p145_p6 = scmp.eq.s32.totalorder %s1302_s18, 5  ;;  %p48_p7 = scmp.eq.s32.totalorder %s45_s22, 0 }
  0x12   : > { %p1318_p8 = por %p64_p5, %p63_p3  ;;  %p151_p10 = scmp.eq.s32.totalorder %s897_s19, 5 }
  0x13   : > { %p1322_p9 = por %p145_p6, %p57_p1  ;;  %p989_p12 = scmp.lt.s32.totalorder %s1237_s17, 6 }
  0x14   : > { %s1578_s23 = scalar_select %p1318_p8, 1, 0 }
  0x15   : > { %s1579_s24 = scalar_select %p1322_p9, 1, 0 }
  0x16   : > { %s1327_s25 = scalar_select %p48_p7, %s1225_s14, %s50_s21  }
  0x17   : > { %p1329_p11 = por %p151_p10, %p63_p3  ;;  %s1335_s27 = sand.u32 1, %s1225_s14  }
  0x18   : > { %p1337_p13 = pnand %p989_p12, %p59_p4  ;;  %s194_s29 = sand.u32 1, %s1237_s17  }
  0x19   : > { %s1580_s26 = scalar_select %p1329_p11, 1, 0 }
  0x1a   : > { %s901_s30 = sshll.u32 %s1335_s27, 4  ;;  %s919_s4 = sshll.u32 %s1233_s16, 8 }
  0x1b   : > { %s198_s5 = scalar_lea.vmem [#allocation8], %s901_s30  ;;  %s1582_s1 = sld [smem:[#allocation17_spill]] }
  0x1c   : > { %s207_s6 = sshll.u32 %s198_s5, 4  ;;  %s1355_s10 = scalar_lea.sflag [#allocation9], %s194_s29  ;;  %s1353_s6 = int_to_ptr.vmem [resolvable:$true] %s207_s6 }
  0x1d   : > { %p1361_p1 = pneg %p1337_p13 }
  0x21   : > { %s1351_s9 = scalar_lea.hbm %s1582_s1, %s919_s4  ;;  %s1066_s5 = scalar_lea.hbm %s1582_s1, 1536 }
  0x22   : > { %s1061_s11 = scalar_lea.hbm %s1351_s9, 256  ;;  %p1067_p4 = scmp.lt.u32.totalorder %s1351_s9, %s1582_s1 }
  0x23   : > { %p1062_p0 = scmp.ne.s32.totalorder %s1351_s9, %s1061_s11  ;;  %p1068_p5 = scmp.lt.u32.totalorder %s1066_s5, %s1061_s11 }
  0x24   : > { %p1070_p7 = scmp.lt.u32.totalorder %s1061_s11, %s1351_s9 }
  0x25   : > { %p1064_p2 = pnand %p1361_p1, %p1062_p0  ;;  %p1069_p6 = por %p1068_p5, %p1067_p4 }
  0x27   : > { %p1065_p3 = pneg %p1064_p2  ;;  %p1071_p10 = por %p1070_p7, %p1069_p6 }
  0x29   : > { %p1072_p12 = pnand %p1071_p10, %p1065_p3 }
  0x2b   : > { %1075 = shalt.err (!%p1072_p12)
}
  0x2c   : > { %s1076_s29 = scalar_lea.vmem %s1353_s6, 256  ;;  %s1239_s21 = smov [#allocation8]  }
  0x2d   : > { %p1077_p0 = scmp.ne.s32.totalorder %s1353_s6, %s1076_s29  ;;  %s1081_s22 = sshll.u32 %s1239_s21, 4  ;;  %s1082_s22 = int_to_ptr.vmem [resolvable:$false] %s1081_s22 }
  0x2e   : > { %s1083_s7 = scalar_lea.vmem %s1082_s22, 512  ;;  %p1084_p9 = scmp.lt.s32.totalorder %s1353_s6, %s1082_s22 }
  0x2f   : > { %p1079_p2 = pnand %p1077_p0, %p1361_p1  ;;  %p1085_p8 = scmp.lt.s32.totalorder %s1083_s7, %s1076_s29 }
  0x31   : > { %p1080_p11 = pneg %p1079_p2  ;;  %p1086_p4 = por %p1085_p8, %p1084_p9 }
  0x33   : > { %p1087_p5 = pnand %p1086_p4, %p1080_p11 }
  0x35   : > { %1090 = shalt.err (!%p1087_p5)
}
  0x36   : > { %s1570_s11 = smov 128   ;;  %s1572_s5 = smov 8  }
  0x37   : > { %981 = dma.hbm_to_vmem [thread:$0]  (!%p1337_p13), %s1351_s9, 256, %s1353_s6, %s1355_s10, %s1570_s11, %s1570_s11, %s1572_s5  }
  0x38   : > { %p907_p8 = scmp.ge.s32.totalorder %s1237_s17, 1  ;;  %p238_p9 = scmp.lt.s32.totalorder %s1237_s17, 7 }
  0x39   : > { %s221_s8 = scalar_lea.vmem [#allocation10], %s901_s30  ;;  %s1401_s1 = scalar_lea.hbm %s1565_s2, %s919_s4 }
  0x3a   : > { %s230_s29 = sshll.u32 %s221_s8, 4  ;;  %p1392_p11 = pnand %p907_p8, %p238_p9  ;;  %s1404_s29 = int_to_ptr.vmem [resolvable:$true] %s230_s29 }
  0x3b   : > { %s963_s20 = smul.u32 24, %s1335_s27  ;;  %s172_s22 = scalar_lea.sflag [#allocation6], %s1335_s27 }
  0x3c   : > { %s1584_s21 = scalar_select %p1392_p11, 1, 0 }
  0x3d   : > { %s964_s6 = smul.u32 384, %s1233_s16  ;;  %s175_s30 = scalar_lea.vmem [#allocation5], %s963_s20 }
  0x3e   : > { %s184_s8 = sshll.u32 %s175_s30, 4  ;;  %s1096_s11 = scalar_lea.hbm %s1563_s0, 2304  ;;  %s1412_s8 = int_to_ptr.vmem [resolvable:$true] %s184_s8 }
  0x3f   : > { %s1410_s5 = scalar_lea.hbm %s1563_s0, %s964_s6 }
  0x40   : > { %s1091_s4 = scalar_lea.hbm %s1410_s5, 384  ;;  %p1097_p10 = scmp.lt.u32.totalorder %s1410_s5, %s1563_s0 }
  0x41   : > { %p1092_p3 = scmp.ne.s32.totalorder %s1410_s5, %s1091_s4  ;;  %p1098_p12 = scmp.lt.u32.totalorder %s1096_s11, %s1091_s4 }
  0x42   : > { %p1100_p2 = scmp.lt.u32.totalorder %s1091_s4, %s1410_s5 }
  0x43   : > { %p1094_p6 = pnand %p1092_p3, %p1361_p1  ;;  %p1099_p0 = por %p1098_p12, %p1097_p10 }
  0x45   : > { %p1095_p7 = pneg %p1094_p6  ;;  %p1101_p4 = por %p1100_p2, %p1099_p0 }
  0x47   : > { %p1102_p5 = pnand %p1101_p4, %p1095_p7 }
  0x49   : > { %1105 = shalt.err (!%p1102_p5)
}
  0x4a   : > { %s1106_s20 = scalar_lea.vmem %s1412_s8, 384  ;;  %s1242_s16 = smov [#allocation5]  }
  0x4b   : > { %p1107_p8 = scmp.ne.s32.totalorder %s1412_s8, %s1106_s20  ;;  %s1111_s30 = sshll.u32 %s1242_s16, 4  ;;  %s1112_s30 = int_to_ptr.vmem [resolvable:$false] %s1111_s30 }
  0x4c   : > { %s1113_s7 = scalar_lea.vmem %s1112_s30, 768  ;;  %p1114_p6 = scmp.lt.s32.totalorder %s1412_s8, %s1112_s30 }
  0x4d   : > { %p1109_p9 = pnand %p1107_p8, %p1361_p1  ;;  %p1115_p11 = scmp.lt.s32.totalorder %s1113_s7, %s1106_s20 }
  0x4f   : > { %p1110_p3 = pneg %p1109_p9  ;;  %p1116_p10 = por %p1115_p11, %p1114_p6 }
  0x51   : > { %p1117_p12 = pnand %p1116_p10, %p1110_p3 }
  0x53   : > { %1120 = shalt.err (!%p1117_p12)
}
  0x54   : > { %s1585_s4 = smov 8   ;;  %s1586_s11 = smov 128  }
  0x55   : > { %978 = dma.hbm_to_vmem [thread:$0]  (!%p1337_p13), %s1410_s5, 384, %s1412_s8, %s172_s22, %s1586_s11, %s1586_s11, %s1585_s4  }
  0x56   : > { %s1121_s6 = scalar_lea.hbm %s1401_s1, 256  ;;  %s1126_s16 = scalar_lea.hbm %s1565_s2, 1536 }
  0x57   : > { %p1122_p7 = scmp.ne.s32.totalorder %s1401_s1, %s1121_s6  ;;  %p1127_p2 = scmp.lt.u32.totalorder %s1401_s1, %s1565_s2 }
  0x58   : > { %p1128_p4 = scmp.lt.u32.totalorder %s1126_s16, %s1121_s6  ;;  %p1130_p8 = scmp.lt.u32.totalorder %s1121_s6, %s1401_s1 }
  0x59   : > { %p1124_p11 = pnand %p1122_p7, %p1361_p1 }
  0x5a   : > { %p1129_p5 = por %p1128_p4, %p1127_p2 }
  0x5b   : > { %p1125_p0 = pneg %p1124_p11 }
  0x5c   : > { %p1131_p9 = por %p1130_p8, %p1129_p5 }
  0x5e   : > { %p1132_p3 = pnand %p1131_p9, %p1125_p0 }
  0x60   : > { %1135 = shalt.err (!%p1132_p3)
}
  0x61   : > { %s1136_s27 = scalar_lea.vmem %s1404_s29, 256  ;;  %s1243_s5 = smov [#allocation10]  }
  0x62   : > { %p1137_p6 = scmp.ne.s32.totalorder %s1404_s29, %s1136_s27  ;;  %s1141_s8 = sshll.u32 %s1243_s5, 4  ;;  %s1142_s8 = int_to_ptr.vmem [resolvable:$false] %s1141_s8 }
  0x63   : > { %s1143_s22 = scalar_lea.vmem %s1142_s8, 512  ;;  %p1144_p7 = scmp.lt.s32.totalorder %s1404_s29, %s1142_s8 }
  0x64   : > { %p1139_p10 = pnand %p1137_p6, %p1361_p1  ;;  %p1145_p11 = scmp.lt.s32.totalorder %s1143_s22, %s1136_s27 }
  0x66   : > { %p1140_p12 = pneg %p1139_p10  ;;  %p1146_p2 = por %p1145_p11, %p1144_p7 }
  0x68   : > { %p1147_p4 = pnand %p1146_p2, %p1140_p12 }
  0x6a   : > { %1150 = shalt.err (!%p1147_p4)
}
  0x6b   : > { %984 = dma.hbm_to_vmem [thread:$0]  (!%p1337_p13), %s1401_s1, 256, %s1404_s29, %s1355_s10, %s1586_s11, %s1586_s11, %s1585_s4  }
  0x6c   : > { %p1587_p1 = scmp.ne.s32.totalorder %s1584_s21, 0 }
  0x6d   : > { %s1469_s19 = sand.u32 (!%p1587_p1), 1, %s1221_s13   ;;  %p1588_p0 = scmp.ne.s32.totalorder (!%p1587_p1), %s1578_s23, 0 }
  0x6e   : > { %242 = sbr.rel (%p1587_p1) target bundleno = 815 (0x32f), region = 32  ;;  %s245_s9 = scalar_lea.sflag (!%p1587_p1), [#allocation6], %s1469_s19 }
  0x6f   : > { %s965_s6 = smul.u32 (!%p1587_p1), 24, %s1469_s19 }
  0x71   : > { %s248_s28 = scalar_lea.vmem (!%p1587_p1), [#allocation5], %s965_s6 }
  0x75   : > { %1204 = dma.done.wait (%p1588_p0), %s245_s9, 384  }
  0x76   : > { %1206 = vsyncadd (%p1588_p0), %s245_s9, 4294966912  ;;  %s253_s1 = sand.u32 1, %s1302_s18   ;;  %s908_s10 = sshll.u32 %s1469_s19, 4 }
  0x77   : > { %s254_s29 = scalar_lea.sflag [#allocation9], %s253_s1  ;;  %s257_s21 = scalar_lea.vmem [#allocation8], %s908_s10 }
  0x78   : > { %1208 = dma.done.wait (%p1588_p0), %s254_s29, 512  }
  0x79   : > { %1210 = vsyncadd (%p1588_p0), %s254_s29, 4294966784  ;;  %v1244_v0 = vmov 0.0|0.0   ;;  %vm1245_vm0 = vmmov 0   ;;  %v1246_v1 = vmov 0.0   ;;  %v309_v2 = vld [vmem:[%s257_s21] sm:$0xff]  ;;  %v310_v3 = vld [vmem:[%s257_s21 + $0x8] sm:$0xff]  ;;  %v394_v11 = vlaneseq }
  0x7a   : > { %957 = vmatprep.subr.bf16.mxu0 %v1244_v0  ;;  %935 = vmatprep.mubr.msk.f32.mxu0 %vm1245_vm0, %v1246_v1  ;;  %v958_v4 = vpack.c.bf16 %v310_v3, %v309_v2  ;;  %v303_v5 = vld [vmem:[%s248_s28] sm:$0xff]  ;;  %v304_v7 = vld [vmem:[%s248_s28 + $0x8] sm:$0xff]  ;;  %v305_v9 = vld [vmem:[%s248_s28 + $0x10] sm:$0xff]  ;;  %vm402_vm2 = vcmask 130048   ;;  %s266_s18 = scalar_lea.vmem [#allocation10], %s908_s10  ;;  %vm422_vm3 = vcmask 7168  }
  0x7b   : > { %960 = vmatprep.subr.bf16.mxu1 %v1244_v0  ;;  %948 = vmatprep.mubr.msk.f32.mxu1 %vm1245_vm0, %v1246_v1  ;;  %v306_v6 = vmul.f32 0.24044918, %v303_v5  ;;  %v307_v8 = vmul.f32 0.24044918, %v304_v7  ;;  %v308_v10 = vmul.f32 0.24044918, %v305_v9 }
  0x7c   : > { %959 = vmatpush3.bf16.xpose.msra.mxu0 %v958_v4  ;;  %v395_v12 = vand.u32 127, %v394_v11  ;;  %v311_v25 = vld [vmem:[%s266_s18] sm:$0xff]  ;;  %v312_v26 = vld [vmem:[%s266_s18 + $0x8] sm:$0xff]  ;;  %v1247_v40 = vmov 0   ;;  %s298_s23 = scalar_lea.vmem [#allocation11], %s965_s6  ;;  %s966_s4 = smul.u32 384, %s1229_s15 }
  0x7d   : > { %v961_v27 = vpack.c.bf16 %v312_v26, %v311_v25  ;;  %1047 = vset.pattern.permute.xlu0 %v1247_v40  ;;  %1048 = vset.pattern.permute.xlu1 %v1247_v40  ;;  %s757_s11 = sshll.u32 %s298_s23, 4  ;;  %s742_s7 = scalar_lea.sflag [#allocation7], %s1469_s19  ;;  %s1515_s11 = int_to_ptr.vmem [resolvable:$true] %s757_s11 }
  0x7e   : > { %vm398_vm1 = vcmp.lt.s32.totalorder %v395_v12, 12  ;;  %s1513_s30 = scalar_lea.hbm %s1566_s3, %s966_s4  ;;  %s1151_s27 = scalar_lea.vmem %s1515_s11, 384 }
  0x7f   : > { %962 = vmatpush3.bf16.msra.mxu1 %v961_v27  ;;  %p1152_p13 = scmp.ne.s32.totalorder %s1515_s11, %s1151_s27  ;;  %p1589_p5 = scmp.ne.s32.totalorder %s1579_s24, 0 }
  0x80   : > { %s1248_s15 = smov [#allocation11]  }
  0x81   : > { %p1153_p8 = pnand %p1152_p13, %p1589_p5  ;;  %s1155_s5 = sshll.u32 %s1248_s15, 4  ;;  %s1156_s5 = int_to_ptr.vmem [resolvable:$false] %s1155_s5 }
  0x82   : > { %s1157_s8 = scalar_lea.vmem %s1156_s5, 768  ;;  %p1158_p3 = scmp.lt.s32.totalorder %s1515_s11, %s1156_s5 }
  0x83   : > { %936 = vmatmul.mubr.f32.vlgmr.msra.gmra.mrb[0].mxu0 %v306_v6  ;;  %p1154_p9 = pneg %p1153_p8  ;;  %p1159_p6 = scmp.lt.s32.totalorder %s1157_s8, %s1151_s27 }
  0x84   : > { %938 = vmatprep.mubr.msk.f32.mxu0 %vm1245_vm0, %v1246_v1 }
  0x85   : > { %p1160_p10 = por %p1159_p6, %p1158_p3 }
  0x87   : > { %939 = vmatmul.mubr.f32.gmra.mrb[2].mxu0 %v307_v8  ;;  %p1161_p12 = pnand %p1160_p10, %p1154_p9 }
  0x88   : > { %941 = vmatprep.mubr.msk.f32.mxu0 %vm1245_vm0, %v1246_v1 }
  0x8b   : > { %942 = vmatmul.mubr.f32.gmra.mrb[4].mxu0 %v308_v10 }
 0x156   : > { %v379_v13 = vpop.f32.mrb[0].mxu0 }
 0x157   : > { %v399_v14 = vsel %vm398_vm1, %v379_v13, -inf  ;;  %v937_v15 = vpop.f32.mrb[1].mxu0 }
 0x158   : > { %v403_v16 = vsel %vm402_vm2, %v399_v14, -inf }
 0x159   : > { %404 = vmax.xlane.f32.xlu0 %v403_v16 }
 0x15a   : > { %v384_v17 = vpop.f32.mrb[2].mxu0 }
 0x15b   : > { %v400_v18 = vsel %vm398_vm1, %v384_v17, -inf  ;;  %v940_v19 = vpop.f32.mrb[3].mxu0 }
 0x15c   : > { %v406_v20 = vsel %vm402_vm2, %v400_v18, -inf }
 0x15d   : > { %407 = vmax.xlane.f32.xlu0 %v406_v20 }
 0x15e   : > { %v389_v21 = vpop.f32.mrb[4].mxu0 }
 0x15f   : > { %v401_v22 = vsel %vm398_vm1, %v389_v21, -inf  ;;  %v943_v23 = vpop.f32.mrb[5].mxu0 }
 0x160   : > { %v409_v24 = vsel %vm402_vm2, %v401_v22, -inf }
 0x161   : > { %410 = vmax.xlane.f32.xlu1 %v409_v24 }
 0x1e6   : > { %v405_v28 = vpop.xlane.xlu0 %404 }
 0x1e7   : > { %v416_v29 = vsub.f32 %v399_v14, %v405_v28 }
 0x1e9   : > { %1049 = vpow2.f32 %v416_v29 }
 0x1ea   : > { %v408_v30 = vpop.xlane.xlu0 %407 }
 0x1eb   : > { %v417_v31 = vsub.f32 %v400_v18, %v408_v30 }
 0x1ed   : > { %1051 = vpow2.f32 %v417_v31 }
 0x1ee   : > { %v411_v32 = vpop.xlane.xlu1 %410 }
 0x1ef   : > { %v418_v33 = vsub.f32 %v401_v22, %v411_v32 }
 0x1f1   : > { %1053 = vpow2.f32 %v418_v33 }
 0x1f3   : > { %v1050_v34 = vpop.eup %1049 }
 0x1f4   : > { %949 = vmatmul.mubr.msk.f32.vlgmr.msra.gmra.mrb[0].mxu1 %vm402_vm2, %v1050_v34  ;;  %v426_v35 = vsel %vm402_vm2, %v1050_v34, 0.0 }
 0x1f5   : > { %427 = vadd.xlane.f32.xlu1 %v426_v35  ;;  %951 = vmatprep.mubr.msk.f32.mxu1 %vm1245_vm0, %v1246_v1 }
 0x1f7   : > { %v1052_v36 = vpop.eup %1051 }
 0x1f8   : > { %952 = vmatmul.mubr.msk.f32.gmra.mrb[2].mxu1 %vm402_vm2, %v1052_v36  ;;  %v429_v37 = vsel %vm402_vm2, %v1052_v36, 0.0 }
 0x1f9   : > { %430 = vadd.xlane.f32.xlu0 %v429_v37  ;;  %954 = vmatprep.mubr.msk.f32.mxu1 %vm1245_vm0, %v1246_v1 }
 0x1fb   : > { %v1054_v38 = vpop.eup %1053 }
 0x1fc   : > { %955 = vmatmul.mubr.msk.f32.gmra.mrb[4].mxu1 %vm402_vm2, %v1054_v38  ;;  %v432_v39 = vsel %vm402_vm2, %v1054_v38, 0.0 }
 0x1fd   : > { %433 = vadd.xlane.f32.xlu1 %v432_v39 }
 0x282   : > { %v428_v41 = vpop.xlane.xlu1 %427 }
 0x283   : > { %435 = vst.msk [vmem:[#allocation3] sm:$0xff] %vm422_vm3, %v428_v41 }
 0x286   : > { %v431_v42 = vpop.xlane.xlu0 %430 }
 0x287   : > { %436 = vst.msk [vmem:[#allocation3 + $0x8] sm:$0xff] %vm422_vm3, %v431_v42 }
 0x28a   : > { %v434_v43 = vpop.xlane.xlu1 %433  ;;  %v714_v44 = vld [vmem:[#allocation3] sm:$0xff] }
 0x28b   : > { %437 = vst.msk [vmem:[#allocation3 + $0x10] sm:$0xff] %vm422_vm3, %v434_v43  ;;  %719 = vperm.xlu0 %1047, %v714_v44  }
 0x28e   : > { %v715_v45 = vld [vmem:[#allocation3 + $0x8] sm:$0xff] }
 0x28f   : > { %724 = vperm.xlu1 %1048, %v715_v45  }
 0x292   : > { %v716_v46 = vld [vmem:[#allocation3 + $0x10] sm:$0xff] }
 0x293   : > { %729 = vperm.xlu1 %1048, %v716_v46  }
 0x2c7   : > { %v513_v47 = vpop.f32.mrb[0].mxu1 }
 0x2c8   : > { %v950_v48 = vpop.f32.mrb[1].mxu1 }
 0x2cb   : > { %v518_v49 = vpop.f32.mrb[2].mxu1 }
 0x2cc   : > { %v953_v50 = vpop.f32.mrb[3].mxu1 }
 0x2cf   : > { %v523_v51 = vpop.f32.mrb[4].mxu1 }
 0x2d0   : > { %v956_v52 = vpop.f32.mrb[5].mxu1 }
 0x30a   : > { %v720_v53 = vpop.permute.xlu0 %719 }
 0x30b   : > { %1055 = vrcp.f32 %v720_v53 }
 0x30e   : > { %v725_v54 = vpop.permute.xlu1 %724 }
 0x30f   : > { %1057 = vrcp.f32 %v725_v54 }
 0x312   : > { %v730_v55 = vpop.permute.xlu1 %729 }
 0x313   : > { %1059 = vrcp.f32 %v730_v55 }
 0x315   : > { %v1056_v56 = vpop.eup %1055 }
 0x316   : > { %v733_v57 = vmul.f32 %v1056_v56, %v513_v47 }
 0x318   : > { %738 = vst [vmem:[%s298_s23] sm:$0xff] %v733_v57 }
 0x319   : > { %v1058_v58 = vpop.eup %1057 }
 0x31a   : > { %v735_v59 = vmul.f32 %v1058_v58, %v518_v49 }
 0x31c   : > { %739 = vst [vmem:[%s298_s23 + $0x8] sm:$0xff] %v735_v59 }
 0x31d   : > { %v1060_v60 = vpop.eup %1059 }
 0x31e   : > { %v737_v61 = vmul.f32 %v1060_v60, %v523_v51 }
 0x320   : > { %740 = vst [vmem:[%s298_s23 + $0x10] sm:$0xff] %v737_v61 }
 0x321   : > { %1164 = shalt.err (!%p1161_p12)
}
 0x322   : > { %s1165_s22 = scalar_lea.hbm %s1513_s30, 384  ;;  %s1169_s28 = scalar_lea.hbm %s1566_s3, 2304 }
 0x323   : > { %p1166_p7 = scmp.ne.s32.totalorder %s1513_s30, %s1165_s22  ;;  %p1170_p4 = scmp.lt.u32.totalorder %s1513_s30, %s1566_s3 }
 0x324   : > { %p1171_p1 = scmp.lt.u32.totalorder %s1169_s28, %s1165_s22  ;;  %p1173_p13 = scmp.lt.u32.totalorder %s1165_s22, %s1513_s30 }
 0x325   : > { %p1167_p11 = pnand %p1166_p7, %p1589_p5 }
 0x326   : > { %p1172_p0 = por %p1171_p1, %p1170_p4 }
 0x327   : > { %p1168_p2 = pneg %p1167_p11 }
 0x328   : > { %p1174_p8 = por %p1173_p13, %p1172_p0 }
 0x32a   : > { %p1175_p9 = pnand %p1174_p8, %p1168_p2 }
 0x32c   : > { %1178 = shalt.err (!%p1175_p9)
}
 0x32d   : > { %s1249_s29 = smov 128   ;;  %s1250_s21 = smov 8  }
 0x32e   : > { %973 = dma.vmem_to_hbm [thread:$0]  (%p1589_p5), %s1515_s11, 384, %s1513_s30, %s742_s7, %s1249_s29, %s1249_s29, %s1250_s21  }
 0x32f PF: > { %p990_p3 = scmp.ge.s32.totalorder %s1237_s17, 2  ;;  %s772_s18 = sand.u32 1, %s1217_s12  }
 0x330   : > { %p1590_p6 = scmp.ne.s32.totalorder %s1580_s26, 0  ;;  %s773_s23 = scalar_lea.sflag [#allocation7], %s772_s18 }
 0x332   : > { %p986_p10 = pnand %p990_p3, %p1590_p6 }
 0x334   : > { %1212 = dma.done.wait (!%p986_p10), %s773_s23, 384  }
 0x335   : > { %1214 = vsyncadd (!%p986_p10), %s773_s23, 4294966912  ;;  %s22_s17 = sadd.s32 1, %s1237_s17   ;;  %s1591_s15 = sld [smem:[#allocation15_spill]] }
 0x336   : > { %p19_p12 = scmp.ge.s32.totalorder %s22_s17, 8   ;;  %s1592_s16 = sld [smem:[#allocation16_spill]] }
 0x337   : > { %s1593_s12 = smov %s1221_s13  ;;  %s1594_s13 = smov %s1225_s14 }
 0x338   : > { %s1595_s14 = smov %s1327_s25  ;;  %21 = sbr.rel (!%p19_p12) target bundleno = 10 (0xa), region = 113 }
 0x33f   :  { %778 = vsyncpa [#allocation6], 1 }
 0x340   :  { %780 = vsyncpa [#allocation6 + $0x1], 1 }
 0x341   :  { %781 = vsyncpa [#allocation9], 1 }
 0x342   :  { %783 = vsyncpa [#allocation9 + $0x1], 1 }
 0x343   :  { %784 = vsyncpa [#allocation7], 1 }
 0x344   :  { %786 = vsyncpa [#allocation7 + $0x1], 1 }

</bundles_post_ra>
